<compile_context>
chip_gen: v6e
topology: v6e:2x2x1
jax: 0.10.0
libtpu: 0.0.40
codegen_flags: <defaults>
</compile_context>

<pallas_src>
import functools

import jax
import jax.numpy as jnp
from jax.experimental import pallas as pl
from jax.experimental.pallas import tpu as pltpu

_EPS = 1e-07


def _column_contrib(exploit, explore):
    """Per-action-column sum over the softmax axis (torch dim=0) of
    log(softmax(exploit) + eps) * softmax(explore), shape (1, tile_a) f32.

    Action columns are independent, so tiling the action axis is exact.
    The explore softmax denominator is factored out of the reduction, so
    soft_explore is never materialized (A reciprocals + A multiplies instead
    of an N*A divide); same e * (1/s) trick for the exploit normalization.
    """
    if exploit.dtype != jnp.float32:  # upcast only if bf16 arrives
        exploit = exploit.astype(jnp.float32)
        explore = explore.astype(jnp.float32)

    # exploit branch: log(softmax + eps); eps kept for exact torch parity.
    m1 = jnp.max(exploit, axis=0, keepdims=True)
    e1 = jnp.exp(exploit - m1)
    inv_s1 = 1.0 / jnp.sum(e1, axis=0, keepdims=True)       # per-column only
    log_exploit = jnp.log(e1 * inv_s1 + _EPS)

    # explore branch: denominator factored out of the reduction.
    m2 = jnp.max(explore, axis=0, keepdims=True)
    e2 = jnp.exp(explore - m2)
    inv_s2 = 1.0 / jnp.sum(e2, axis=0, keepdims=True)       # per-column only
    col = jnp.sum(log_exploit * e2, axis=0, keepdims=True)  # (1, tile_a)
    return col * inv_s2


def _single_block_kernel(exploit_ref, explore_ref, out_ref, *, inv_count):
    """Whole problem in one block: finalize in-kernel, scalar SMEM output."""
    contrib = _column_contrib(exploit_ref[...], explore_ref[...])
    out_ref[0, 0] = -jnp.sum(contrib) * inv_count


def _tiled_kernel(exploit_ref, explore_ref, out_ref):
    """One lane-dense action tile per grid step; fully parallel across tiles."""
    out_ref[...] = _column_contrib(exploit_ref[...], explore_ref[...])


def _pick_tile(n_rows, n_cols, itemsize):
    """Lane-dense (multiple-of-128) action tile grown toward ~1 MiB/input
    block when the action count allows tiling, else the full extent."""
    if n_cols % 128 != 0:
        return n_cols
    tile = 128
    target_bytes = 1 << 20  # ~1 MiB per input block; x2 inputs x2 buffers
    while (tile * 2 <= n_cols
           and n_cols % (tile * 2) == 0
           and n_rows * (tile * 2) * itemsize <= target_bytes):
        tile *= 2
    return tile


def cross_ent_loss(exploit_q_values, explore_q_values):
    """Pallas TPU implementation of cross_ent_loss.forward. Returns a scalar."""
    assert exploit_q_values.shape == explore_q_values.shape
    assert exploit_q_values.ndim == 2
    n_rows, n_cols = exploit_q_values.shape
    itemsize = jnp.dtype(exploit_q_values.dtype).itemsize

    tile_a = _pick_tile(n_rows, n_cols, itemsize)
    num_blocks = n_cols // tile_a
    inv_count = 1.0 / float(n_rows * n_cols)

    if num_blocks == 1:
        # Launch-bound path (e.g. the production (8, 32) shape): one block,
        # one launch, scalar out. Two inputs DMA concurrently (no jnp.stack).
        kernel = functools.partial(_single_block_kernel, inv_count=inv_count)
        out = pl.pallas_call(
            kernel,
            out_shape=jax.ShapeDtypeStruct((1, 1), jnp.float32),
            grid=(1,),
            in_specs=[pl.BlockSpec((n_rows, n_cols), lambda j: (0, 0)),
                      pl.BlockSpec((n_rows, n_cols), lambda j: (0, 0))],
            out_specs=pl.BlockSpec(memory_space=pltpu.SMEM),
            compiler_params=pltpu.CompilerParams(
                dimension_semantics=("arbitrary",)),
        )(exploit_q_values, explore_q_values)
        return out[0, 0]

    # Streaming path for large action counts: parallel grid over lane-dense
    # action tiles, per-column contributions written to a lane-dense output.
    partial = pl.pallas_call(
        _tiled_kernel,
        out_shape=jax.ShapeDtypeStruct((1, n_cols), jnp.float32),
        grid=(num_blocks,),
        in_specs=[pl.BlockSpec((n_rows, tile_a), lambda j: (0, j)),
                  pl.BlockSpec((n_rows, tile_a), lambda j: (0, j))],
        out_specs=pl.BlockSpec((1, tile_a), lambda j: (0, j)),
        compiler_params=pltpu.CompilerParams(
            dimension_semantics=("parallel",)),  # megacore sharding on v7x
    )(exploit_q_values, explore_q_values)
    # Tiny final reduce over n_cols f32 values; negligible vs streaming the
    # (N, A) inputs, and keeps the grid fully parallel (no serialized acc).
    return -jnp.sum(partial) * inv_count


def _reference(exploit_q, explore_q, eps=_EPS):
    sm_exploit = jax.nn.softmax(exploit_q, axis=0)
    sm_explore = jax.nn.softmax(explore_q, axis=0)
    return -jnp.mean(jnp.log(sm_exploit + eps) * sm_explore)


if __name__ == "__main__":
    key = jax.random.PRNGKey(0)
    k1, k2, k3, k4, k5, k6 = jax.random.split(key, 6)

    # production-like small shape: 8 rows (softmax axis) x 32 actions
    exploit_q = jax.random.normal(k1, (8, 32), dtype=jnp.float32)
    explore_q = jax.random.normal(k2, (8, 32), dtype=jnp.float32)
    loss = jax.block_until_ready(cross_ent_loss(exploit_q, explore_q))
    ref = _reference(exploit_q, explore_q)
    assert jnp.allclose(loss, ref, rtol=1e-5, atol=1e-6), (loss, ref)

    # larger action count: exercises the parallel lane-dense tiled path
    exploit_q2 = jax.random.normal(k3, (8, 384), dtype=jnp.float32)
    explore_q2 = jax.random.normal(k4, (8, 384), dtype=jnp.float32)
    loss2 = jax.block_until_ready(cross_ent_loss(exploit_q2, explore_q2))
    ref2 = _reference(exploit_q2, explore_q2)
    assert jnp.allclose(loss2, ref2, rtol=1e-5, atol=1e-6), (loss2, ref2)

    # odd shape (non-multiple-of-8 rows, non-multiple-of-128 cols): full block
    exploit_q3 = jax.random.normal(k5, (5, 48), dtype=jnp.float32)
    explore_q3 = jax.random.normal(k6, (5, 48), dtype=jnp.float32)
    loss3 = jax.block_until_ready(cross_ent_loss(exploit_q3, explore_q3))
    ref3 = _reference(exploit_q3, explore_q3)
    assert jnp.allclose(loss3, ref3, rtol=1e-5, atol=1e-6), (loss3, ref3)

    print("KERNEL_OK")
</pallas_src>

<mosaic_0001>
module attributes {stable_mosaic.version = 11 : i64} {
  func.func @_single_block_kernel(%arg0: i32, %arg1: memref<8x32xf32, #tpu.memory_space<vmem>>, %arg2: memref<8x32xf32, #tpu.memory_space<vmem>>, %arg3: memref<1x1xf32, #tpu.memory_space<smem>>) attributes {dimension_semantics = [#tpu.dimension_semantics<arbitrary>], iteration_bounds = array<i64: 1>, scalar_prefetch = 0 : i64, scratch_operands = 0 : i64, tpu.core_type = #tpu.core_type<tc>, window_params = [{pipeline_mode = #tpu.pipeline_mode<synchronous>, transform_indices = @transform_0, window_bounds = array<i64: 8, 32>}, {pipeline_mode = #tpu.pipeline_mode<synchronous>, transform_indices = @transform_1, window_bounds = array<i64: 8, 32>}, {transform_indices = @transform_2, window_bounds = array<i64: 1, 1>}]} {
    %c0 = arith.constant 0 : index
    %c0_0 = arith.constant 0 : index
    %0 = vector.load %arg1[%c0, %c0_0] : memref<8x32xf32, #tpu.memory_space<vmem>>, vector<8x32xf32>
    %c0_1 = arith.constant 0 : index
    %c0_2 = arith.constant 0 : index
    %1 = vector.load %arg2[%c0_1, %c0_2] : memref<8x32xf32, #tpu.memory_space<vmem>>, vector<8x32xf32>
    %cst = arith.constant dense<0xFF800000> : vector<32xf32>
    %2 = vector.multi_reduction <maximumf>, %0, %cst [0] : vector<8x32xf32> to vector<32xf32>
    %3 = vector.shape_cast %2 : vector<32xf32> to vector<1x32xf32>
    %4 = vector.broadcast %3 : vector<1x32xf32> to vector<8x32xf32>
    %5 = arith.subf %0, %4 : vector<8x32xf32>
    %6 = math.exp %5 : vector<8x32xf32>
    %cst_3 = arith.constant dense<0.000000e+00> : vector<32xf32>
    %7 = vector.multi_reduction <add>, %6, %cst_3 [0] : vector<8x32xf32> to vector<32xf32>
    %8 = vector.shape_cast %7 : vector<32xf32> to vector<1x32xf32>
    %cst_4 = arith.constant 1.000000e+00 : f32
    %9 = vector.broadcast %cst_4 : f32 to vector<1x32xf32>
    %10 = arith.divf %9, %8 : vector<1x32xf32>
    %11 = vector.broadcast %10 : vector<1x32xf32> to vector<8x32xf32>
    %12 = arith.mulf %6, %11 : vector<8x32xf32>
    %cst_5 = arith.constant 1.000000e-07 : f32
    %13 = vector.broadcast %cst_5 : f32 to vector<8x32xf32>
    %14 = arith.addf %12, %13 : vector<8x32xf32>
    %15 = math.log %14 : vector<8x32xf32>
    %cst_6 = arith.constant dense<0xFF800000> : vector<32xf32>
    %16 = vector.multi_reduction <maximumf>, %1, %cst_6 [0] : vector<8x32xf32> to vector<32xf32>
    %17 = vector.shape_cast %16 : vector<32xf32> to vector<1x32xf32>
    %18 = vector.broadcast %17 : vector<1x32xf32> to vector<8x32xf32>
    %19 = arith.subf %1, %18 : vector<8x32xf32>
    %20 = math.exp %19 : vector<8x32xf32>
    %cst_7 = arith.constant dense<0.000000e+00> : vector<32xf32>
    %21 = vector.multi_reduction <add>, %20, %cst_7 [0] : vector<8x32xf32> to vector<32xf32>
    %22 = vector.shape_cast %21 : vector<32xf32> to vector<1x32xf32>
    %cst_8 = arith.constant 1.000000e+00 : f32
    %23 = vector.broadcast %cst_8 : f32 to vector<1x32xf32>
    %24 = arith.divf %23, %22 : vector<1x32xf32>
    %25 = arith.mulf %15, %20 : vector<8x32xf32>
    %cst_9 = arith.constant dense<0.000000e+00> : vector<32xf32>
    %26 = vector.multi_reduction <add>, %25, %cst_9 [0] : vector<8x32xf32> to vector<32xf32>
    %27 = vector.shape_cast %26 : vector<32xf32> to vector<1x32xf32>
    %28 = arith.mulf %27, %24 : vector<1x32xf32>
    %29 = vector.shape_cast %28 : vector<1x32xf32> to vector<1x1x32xf32>
    %cst_10 = arith.constant dense<0.000000e+00> : vector<1xf32>
    %30 = vector.multi_reduction <add>, %29, %cst_10 [1, 2] : vector<1x1x32xf32> to vector<1xf32>
    %31 = vector.shape_cast %30 : vector<1xf32> to vector<1x1x1xf32>
    %32 = vector.extract %31[0, 0, 0] : f32 from vector<1x1x1xf32>
    %cst_11 = arith.constant 0.000000e+00 : f32
    %33 = arith.subf %cst_11, %32 : f32
    %cst_12 = arith.constant 3.906250e-03 : f32
    %34 = arith.mulf %33, %cst_12 : f32
    %c0_13 = arith.constant 0 : index
    %c0_14 = arith.constant 0 : index
    %35 = memref.load %arg3[%c0_13, %c0_14] : memref<1x1xf32, #tpu.memory_space<smem>>
    memref.store %34, %arg3[%c0_13, %c0_14] : memref<1x1xf32, #tpu.memory_space<smem>>
    return
  }
  func.func @transform_0(%arg0: i32) -> (i32, i32) {
    %c0_i32 = arith.constant 0 : i32
    %c0_i32_0 = arith.constant 0 : i32
    %c0_i32_1 = arith.constant 0 : i32
    return %c0_i32, %c0_i32_0 : i32, i32
  }
  func.func @transform_1(%arg0: i32) -> (i32, i32) {
    %c0_i32 = arith.constant 0 : i32
    %c0_i32_0 = arith.constant 0 : i32
    %c0_i32_1 = arith.constant 0 : i32
    return %c0_i32, %c0_i32_0 : i32, i32
  }
  func.func @transform_2(%arg0: i32) -> (i32, i32) {
    %c0_i32 = arith.constant 0 : i32
    %c0_i32_0 = arith.constant 0 : i32
    %c0_i32_1 = arith.constant 0 : i32
    return %c0_i32, %c0_i32_0 : i32, i32
  }
}

</mosaic_0001>

<bundles_post_ra>
// kernel: tpu_custom_call.1
= control target key start
LH: loop header
LB: loop body
LE: loop exit
PB: predicated region body
PF: predicated region fallthrough
CT: control target
= control target key end

     0   :  { %7 = vsyncpa [#allocation3], 0  ;;  %s221_s0 = inlined_call_operand.hbm [shape: f32[8,32], index: 0, kind: input, shape index: {}]   ;;  %s222_s1 = inlined_call_operand.hbm [shape: f32[8,32], index: 1, kind: input, shape index: {}]   ;;  %s223_s2 = inlined_call_operand.hbm [shape: f32[1,1], index: 2, kind: output, shape index: {}]  }
   0x1   :  { %8 = vsyncpa [#allocation6], 0 }
   0x2   :  { %9 = vsyncpa [#allocation4], 0  ;;  %s189_s9 = smov [#allocation2]   ;;  %s190_s11 = smov [#allocation5]  }
   0x3   :  { %s16_s10 = sshll.u32 %s189_s9, 4  ;;  %s26_s12 = sshll.u32 %s190_s11, 4  ;;  %s17_s10 = int_to_ptr.vmem [resolvable:$true] %s16_s10  ;;  %s27_s12 = int_to_ptr.vmem [resolvable:$true] %s26_s12 }
   0x4   :  { %s143_s13 = scalar_lea.vmem %s17_s10, 128  ;;  %p148_p1 = scmp.lt.s32.totalorder %s17_s10, %s17_s10 }
   0x5   :  { %p144_p0 = scmp.ne.s32.totalorder %s17_s10, %s143_s13  ;;  %p149_p2 = scmp.lt.s32.totalorder %s143_s13, %s143_s13 }
   0x7   :  { %p150_p3 = por %p149_p2, %p148_p1 }
   0x9   :  { %p151_p4 = pnand %p150_p3, %p144_p0 }
   0xb   :  { %154 = shalt.err (!%p151_p4)
}
   0xc   :  { %19 = dma.hbm_to_vmem [thread:$0]  %s221_s0, 128, %s17_s10, [#allocation3]  }
   0xd   :  { %s163_s16 = scalar_lea.vmem %s27_s12, 128  ;;  %p168_p6 = scmp.lt.s32.totalorder %s27_s12, %s27_s12 }
   0xe   :  { %p164_p5 = scmp.ne.s32.totalorder %s27_s12, %s163_s16  ;;  %p169_p7 = scmp.lt.s32.totalorder %s163_s16, %s163_s16 }
  0x10   :  { %p170_p8 = por %p169_p7, %p168_p6 }
  0x12   :  { %p171_p9 = pnand %p170_p8, %p164_p5 }
  0x14   :  { %174 = shalt.err (!%p171_p9)
}
  0x15   :  { %29 = dma.hbm_to_vmem [thread:$0]  %s222_s1, 128, %s27_s12, [#allocation6]  }
  0x16   :  { %183 = dma.done.wait [#allocation3], 128  }
  0x17   :  { %184 = vsyncadd [#allocation3], 4294967168 }
  0x18   :  { %185 = dma.done.wait [#allocation6], 128  }
  0x19   :  { %186 = vsyncadd [#allocation6], 4294967168  ;;  %vm38_vm0 = vcmask 261120   ;;  %v36_v0 = vld [vmem:[#allocation2] sm:$0xff]  ;;  %v37_v1 = vld [vmem:[#allocation5] sm:$0xff]  ;;  %vm90_vm1 = vcmask 253952  }
  0x1a   :  { %v39_v2 = vsel %vm38_vm0, %v36_v0, -inf  ;;  %v62_v3 = vsel %vm38_vm0, %v37_v1, -inf  ;;  %s191_s20 = smov [#allocation7]  }
  0x1b   :  { %v40_v4 = vrot.slane %v39_v2, 4  ;;  %v63_v5 = vrot.slane %v62_v3, 4 }
  0x1d   :  { %v41_v6 = vmax.f32 %v39_v2, %v40_v4  ;;  %v64_v8 = vmax.f32 %v62_v3, %v63_v5 }
  0x1f   :  { %v42_v7 = vrot.slane %v41_v6, 2  ;;  %v65_v11 = vrot.slane %v64_v8, 2 }
  0x21   :  { %v43_v9 = vmax.f32 %v41_v6, %v42_v7  ;;  %v66_v14 = vmax.f32 %v64_v8, %v65_v11 }
  0x23   :  { %v44_v10 = vrot.slane %v43_v9, 1  ;;  %v67_v16 = vrot.slane %v66_v14, 1 }
  0x25   :  { %v45_v12 = vmax.f32 %v43_v9, %v44_v10  ;;  %v68_v17 = vmax.f32 %v66_v14, %v67_v16 }
  0x27   :  { %v46_v13 = vsub.f32 %v36_v0, %v45_v12  ;;  %v69_v18 = vsub.f32 %v37_v1, %v68_v17 }
  0x29   :  { %v47_v15 = vmul.f32 1.442695, %v46_v13  ;;  %v70_v20 = vmul.f32 1.442695, %v69_v18 }
  0x2b   :  { %125 = vpow2.f32 %v47_v15 }
  0x2c   :  { %127 = vpow2.f32 %v70_v20 }
  0x38   :  { %v126_v19 = vpop.eup %125 }
  0x39   :  { %v49_v21 = vsel %vm38_vm0, %v126_v19, 0.0  ;;  %v128_v28 = vpop.eup %127 }
  0x3a   :  { %v50_v22 = vrot.slane %v49_v21, 4  ;;  %v72_v29 = vsel %vm38_vm0, %v128_v28, 0.0 }
  0x3b   :  { %v73_v30 = vrot.slane %v72_v29, 4 }
  0x3c   :  { %v51_v23 = vadd.f32 %v50_v22, %v49_v21 }
  0x3d   :  { %v74_v32 = vadd.f32 %v73_v30, %v72_v29 }
  0x3e   :  { %v52_v24 = vrot.slane %v51_v23, 2 }
  0x3f   :  { %v75_v35 = vrot.slane %v74_v32, 2 }
  0x40   :  { %v53_v25 = vadd.f32 %v52_v24, %v51_v23 }
  0x41   :  { %v76_v36 = vadd.f32 %v75_v35, %v74_v32 }
  0x42   :  { %v54_v26 = vrot.slane %v53_v25, 1 }
  0x43   :  { %v77_v37 = vrot.slane %v76_v36, 1 }
  0x44   :  { %v55_v27 = vadd.f32 %v54_v26, %v53_v25 }
  0x45   :  { %v78_v38 = vadd.f32 %v77_v37, %v76_v36 }
  0x46   :  { %129 = vrcp.f32 %v55_v27 }
  0x53   :  { %v130_v31 = vpop.eup %129 }
  0x54   :  { %v58_v33 = vmul.f32 %v130_v31, %v126_v19 }
  0x56   :  { %v59_v34 = vadd.f32 1e-07, %v58_v33 }
  0x58   :  { %131 = vlog2.f32 %v59_v34 }
  0x59   :  { %133 = vrcp.f32 %v78_v38 }
  0x65   :  { %v132_v39 = vpop.eup %131 }
  0x66   :  { %v61_v40 = vmul.f32 0.6931472, %v132_v39  ;;  %v134_v48 = vpop.eup %133 }
  0x68   :  { %v81_v41 = vmul.f32 %v128_v28, %v61_v40 }
  0x6a   :  { %v82_v42 = vsel %vm38_vm0, %v81_v41, 0.0 }
  0x6b   :  { %v83_v43 = vrot.slane %v82_v42, 4 }
  0x6d   :  { %v84_v44 = vadd.f32 %v83_v43, %v82_v42 }
  0x6f   :  { %v85_v45 = vrot.slane %v84_v44, 2 }
  0x71   :  { %v86_v46 = vadd.f32 %v85_v45, %v84_v44 }
  0x73   :  { %v87_v47 = vrot.slane %v86_v46, 1 }
  0x75   :  { %v88_v49 = vadd.f32 %v87_v47, %v86_v46 }
  0x77   :  { %v89_v50 = vmul.f32 %v134_v48, %v88_v49 }
  0x79   :  { %v91_v51 = vsel %vm90_vm1, %v89_v50, 0.0 }
  0x7a   :  { %92 = vadd.xlane.f32.xlu0 %v91_v51 }
 0x103   :  { %v93_v52 = vpop.xlane.xlu0 %92 }
 0x104   :  { %v94_v53 = vrot.slane %v93_v52, 4 }
 0x106   :  { %v95_v54 = vadd.f32 %v94_v53, %v93_v52 }
 0x108   :  { %v96_v55 = vrot.slane %v95_v54, 2 }
 0x10a   :  { %v97_v56 = vadd.f32 %v96_v55, %v95_v54 }
 0x10c   :  { %v98_v57 = vrot.slane %v97_v56, 1 }
 0x10e   :  { %v99_v58 = vadd.f32 %v98_v57, %v97_v56 }
 0x110   :  { %120 = vpush %v99_v58 }
 0x141   :  { %s121_s0 = spop %120 }
 0x142   :  { %s101_s1 = ssub.f32 0.0, %s121_s0 }
 0x144   :  { %s102_s19 = smul.f32 0.00390625, %s101_s1 }
 0x146   :  { %104 = sst [smem:[#allocation7]] %s102_s19 }
 0x147   :  { %112 = dma.smem_to_hbm %s191_s20, 16, %s223_s2, [#allocation4]  }
 0x148   :  { %187 = dma.done.wait [#allocation4], 16  }
 0x149   :  { %188 = vsyncadd [#allocation4], 4294967280 }
 0x14a   :  { %116 = sfence }
 0x14b   :  { %117 = vsyncpa [#allocation3], 1 }
 0x14c   :  { %118 = vsyncpa [#allocation6], 1 }
 0x14d   :  { %119 = vsyncpa [#allocation4], 1 }

</bundles_post_ra>
